<compile_context>
chip_gen: v5e
topology: v5e:2x2
jax: 0.10.0
libtpu: 0.0.40
codegen_flags: <defaults>
</compile_context>

<pallas_src>
import jax
import jax.numpy as jnp
from jax import lax
from jax.experimental import pallas as pl
from jax.experimental.pallas import tpu as pltpu

_LANES = 128


def _num_tensorcores():
    """Best-effort TensorCore count (2 on v7x, 1 on v5e/v6e); safe fallback 1."""
    try:
        info = pltpu.get_tpu_info()
    except Exception:
        return 1
    for name in ("num_cores", "core_count", "num_tensorcores",
                 "num_tensor_cores", "tensorcore_count"):
        val = getattr(info, name, None)
        if isinstance(val, int) and 1 <= val <= 8:
            return val
    return 1


def bce_with_logits_loss(logits, labels, *, tile_n=None, num_cores=None):
    """Mean BCEWithLogitsLoss over same-shaped logits/labels via a Pallas reduction."""
    assert logits.shape == labels.shape
    total = int(logits.size)
    assert total > 0

    if labels.dtype == jnp.bool_:
        labels = labels.astype(jnp.int8)  # 1 B/elem on the wire; cast in-kernel

    # ---- lane-dense (M, 128) repack (no-op copy when C % 128 == 0) ----------
    m_rows = pl.cdiv(total, _LANES)
    full_rows, rem = divmod(total, _LANES)       # rows fully valid / tail lanes
    pad = m_rows * _LANES - total

    def to_lane_dense(a):
        flat = a.reshape(-1)
        if pad:
            flat = jnp.pad(flat, (0, pad))
        return flat.reshape(m_rows, _LANES)

    logits2d = to_lane_dense(logits)
    labels2d = to_lane_dense(labels)

    cores = _num_tensorcores() if num_cores is None else int(num_cores)

    # ---- tile sizing ---------------------------------------------------------
    bytes_per_row = _LANES * (logits2d.dtype.itemsize + labels2d.dtype.itemsize)
    if tile_n is None:
        # ~2 MiB combined input bytes per grid step (4 MiB when multi-core):
        # big enough to hide the ~0.35 us per-step pipeline overhead, small
        # enough that the f32 temporaries + double buffers stay well under the
        # 48 MiB VMEM limit (and v7x's 64 MiB physical VMEM).
        target_bytes = (4 if cores > 1 else 2) * 1024 * 1024
        tile_n = target_bytes // bytes_per_row
    tile_n = max(32, (int(tile_n) // 32) * 32)       # %32: int8 sublane tiling
    tile_n = min(tile_n, pl.cdiv(m_rows, 32) * 32)   # don't exceed the data

    total_tiles = pl.cdiv(m_rows, tile_n)

    num_splits = cores if (cores > 1 and total_tiles >= cores) else 1
    tiles_per_split = pl.cdiv(total_tiles, num_splits)

    def kernel(logits_ref, labels_ref, out_ref):
        if num_splits > 1:
            i, k = pl.program_id(0), pl.program_id(1)
            tile_idx = i * tiles_per_split + k
            is_first = k == 0
        else:
            tile_idx = pl.program_id(0)
            is_first = tile_idx == 0

        @pl.when(is_first)
        def _init():
            out_ref[...] = jnp.zeros_like(out_ref)

        row_start = tile_idx * tile_n

        # Skip fully-duplicated (clamped) tiles of the last split entirely.
        @pl.when(row_start < m_rows)
        def _compute():
            x = logits_ref[...].astype(jnp.float32)
            y = labels_ref[...].astype(jnp.float32)
            per_elem = (jnp.maximum(x, 0.0) - x * y
                        + jnp.log1p(jnp.exp(-jnp.abs(x))))

            def fold(v):
                # (tile_n, 128) -> (8, 128): tile-aligned reshape, pure VPU adds.
                return v.reshape(tile_n // 8, 8, _LANES).sum(axis=0)

            # Interior tiles: no masking work at all.
            @pl.when(row_start + tile_n <= full_rows)
            def _interior():
                out_ref[...] += fold(per_elem)

            # Boundary tile(s): element-level mask (select, so garbage NaN/Inf
            # from OOB rows is discarded, never propagated).
            @pl.when(row_start + tile_n > full_rows)
            def _boundary():
                rows = row_start + lax.broadcasted_iota(jnp.int32, (tile_n, 1), 0)
                lanes = lax.broadcasted_iota(jnp.int32, (1, _LANES), 1)
                valid = (rows < full_rows) | ((rows == full_rows) & (lanes < rem))
                out_ref[...] += fold(jnp.where(valid, per_elem, 0.0))

    if num_splits > 1:
        grid = (num_splits, tiles_per_split)

        def in_map(i, k):
            # Clamp so the DMA never targets a block fully past the array end;
            # those tiles are skipped by the pl.when above.
            return (jnp.minimum(i * tiles_per_split + k, total_tiles - 1), 0)

        out_map = lambda i, k: (i, 0)
        # CORE_PARALLEL actually shards the leading axis across TensorCores
        # (plain "parallel" does not change core-sharding codegen).
        dims = (getattr(pltpu, "CORE_PARALLEL", "parallel"), "arbitrary")
    else:
        grid = (total_tiles,)
        in_map = lambda k: (k, 0)
        out_map = lambda k: (0, 0)
        dims = ("arbitrary",)

    bytes_in = (logits2d.size * logits2d.dtype.itemsize
                + labels2d.size * labels2d.dtype.itemsize)
    padded_elems = m_rows * _LANES

    partials = pl.pallas_call(
        kernel,
        out_shape=jax.ShapeDtypeStruct((num_splits * 8, _LANES), jnp.float32),
        grid=grid,
        in_specs=[pl.BlockSpec((tile_n, _LANES), in_map),
                  pl.BlockSpec((tile_n, _LANES), in_map)],
        out_specs=pl.BlockSpec((8, _LANES), out_map),
        compiler_params=pltpu.CompilerParams(
            dimension_semantics=dims,
            vmem_limit_bytes=48 * 1024 * 1024),
        cost_estimate=pl.CostEstimate(
            flops=5 * padded_elems,
            transcendentals=2 * padded_elems,
            bytes_accessed=bytes_in + num_splits * 8 * _LANES * 4),
    )(logits2d, labels2d)

    # Tiny finalization: cross-lane reduce of (num_splits*8, 128) + true-N mean.
    return jnp.sum(partials) / total


def mi_loss_forward(logits, labels, loss_weight, *, tile_n=None, num_cores=None):
    """MILoss.forward equivalent: returns (reg_loss + w * lsp_loss, lsp_loss)."""
    reg_loss = bce_with_logits_loss(logits, labels, tile_n=tile_n, num_cores=num_cores)
    # TODO(synk): gen_mi_loss / t_model / graph / middle_feats_s are external,
    # undefined code in the provided source; the MI term is left as 0 rather
    # than fabricating its semantics.
    lsp_loss = jnp.float32(0.0)
    total = reg_loss + loss_weight * lsp_loss
    return total, lsp_loss


if __name__ == "__main__":
    key = jax.random.PRNGKey(0)
    k1, k2, k3, k4 = jax.random.split(key, 4)

    # Case 1: lane-aligned C=128, bf16 logits, int8 {0,1} labels, tile_n=32
    # forces a multi-tile grid (accumulator + clamped-tile paths exercised).
    N1, C1 = 96, 128
    logits1 = jax.random.normal(k1, (N1, C1), dtype=jnp.float32).astype(jnp.bfloat16)
    labels1 = (jax.random.uniform(k2, (N1, C1)) > 0.5).astype(jnp.int8)
    w1 = 0.1

    total1, lsp1 = mi_loss_forward(logits1, labels1, w1, tile_n=32)
    jax.block_until_ready(total1)
    jax.block_until_ready(lsp1)

    x1 = logits1.astype(jnp.float32)
    y1 = labels1.astype(jnp.float32)
    ref1 = jnp.mean(jnp.maximum(x1, 0.0) - x1 * y1 + jnp.log1p(jnp.exp(-jnp.abs(x1))))
    assert jnp.allclose(total1, ref1 + w1 * 0.0, atol=1e-5, rtol=1e-5), (total1, ref1)
    assert jnp.allclose(lsp1, 0.0), lsp1

    # Case 2: C=50 (not a multiple of 128) -> lane-dense repack + element-level
    # tail masking; soft float labels exercise the generic-dtype path.
    N2, C2 = 96, 50
    logits2 = jax.random.normal(k3, (N2, C2), dtype=jnp.float32)
    labels2 = jax.random.uniform(k4, (N2, C2), dtype=jnp.float32)
    w2 = 0.5

    total2, lsp2 = mi_loss_forward(logits2, labels2, w2, tile_n=32)
    jax.block_until_ready(total2)
    jax.block_until_ready(lsp2)

    ref2 = jnp.mean(jnp.maximum(logits2, 0.0) - logits2 * labels2
                    + jnp.log1p(jnp.exp(-jnp.abs(logits2))))
    assert jnp.allclose(total2, ref2 + w2 * 0.0, atol=1e-5, rtol=1e-5), (total2, ref2)
    assert jnp.allclose(lsp2, 0.0), lsp2

    print("KERNEL_OK")
</pallas_src>

<mosaic_0001>
module attributes {stable_mosaic.version = 11 : i64} {
  func.func @kernel(%arg0: i32, %arg1: memref<32x128xbf16, #tpu.memory_space<vmem>>, %arg2: memref<32x128xi8, #tpu.memory_space<vmem>>, %arg3: memref<8x128xf32, #tpu.memory_space<vmem>>) attributes {dimension_semantics = [#tpu.dimension_semantics<arbitrary>], iteration_bounds = array<i64: 3>, scalar_prefetch = 0 : i64, scratch_operands = 0 : i64, tpu.core_type = #tpu.core_type<tc>, window_params = [{transform_indices = @transform_0, window_bounds = array<i64: 32, 128>}, {transform_indices = @transform_1, window_bounds = array<i64: 32, 128>}, {pipeline_mode = #tpu.pipeline_mode<synchronous>, transform_indices = @transform_2, window_bounds = array<i64: 8, 128>}]} {
    %c0_i32 = arith.constant 0 : i32
    %0 = arith.cmpi eq, %arg0, %c0_i32 : i32
    %1 = arith.extui %0 : i1 to i32
    %c0_i32_0 = arith.constant 0 : i32
    %2 = arith.cmpi ne, %1, %c0_i32_0 : i32
    scf.if %2 {
      %cst = arith.constant 0.000000e+00 : f32
      %7 = vector.broadcast %cst : f32 to vector<8x128xf32>
      %c0 = arith.constant 0 : index
      %c0_2 = arith.constant 0 : index
      %8 = vector.load %arg3[%c0, %c0_2] : memref<8x128xf32, #tpu.memory_space<vmem>>, vector<8x128xf32>
      tpu.vector_store %arg3[%c0, %c0_2], %7 {strides = array<i32>} : memref<8x128xf32, #tpu.memory_space<vmem>>, vector<8x128xf32>,
    } else {
    }
    %c32_i32 = arith.constant 32 : i32
    %3 = arith.muli %arg0, %c32_i32 : i32
    %c96_i32 = arith.constant 96 : i32
    %4 = arith.cmpi slt, %3, %c96_i32 : i32
    %5 = arith.extui %4 : i1 to i32
    %c0_i32_1 = arith.constant 0 : i32
    %6 = arith.cmpi ne, %5, %c0_i32_1 : i32
    scf.if %6 {
      %c0 = arith.constant 0 : index
      %c0_2 = arith.constant 0 : index
      %7 = vector.load %arg1[%c0, %c0_2] : memref<32x128xbf16, #tpu.memory_space<vmem>>, vector<32x128xbf16>
      %8 = arith.extf %7 : vector<32x128xbf16> to vector<32x128xf32>
      %c0_3 = arith.constant 0 : index
      %c0_4 = arith.constant 0 : index
      %9 = vector.load %arg2[%c0_3, %c0_4] : memref<32x128xi8, #tpu.memory_space<vmem>>, vector<32x128xi8>
      %10 = arith.sitofp %9 : vector<32x128xi8> to vector<32x128xf32>
      %cst = arith.constant 0.000000e+00 : f32
      %11 = vector.broadcast %cst : f32 to vector<32x128xf32>
      %12 = arith.maximumf %8, %11 : vector<32x128xf32>
      %13 = arith.mulf %8, %10 : vector<32x128xf32>
      %14 = arith.subf %12, %13 : vector<32x128xf32>
      %15 = math.absf %8 : vector<32x128xf32>
      %cst_5 = arith.constant 0.000000e+00 : f32
      %16 = vector.broadcast %cst_5 : f32 to vector<32x128xf32>
      %17 = arith.subf %16, %15 : vector<32x128xf32>
      %18 = math.exp %17 : vector<32x128xf32>
      %19 = math.log1p %18 : vector<32x128xf32>
      %20 = arith.addf %14, %19 : vector<32x128xf32>
      %c32_i32_6 = arith.constant 32 : i32
      %21 = arith.addi %3, %c32_i32_6 : i32
      %c96_i32_7 = arith.constant 96 : i32
      %22 = arith.cmpi sle, %21, %c96_i32_7 : i32
      %23 = arith.extui %22 : i1 to i32
      %c0_i32_8 = arith.constant 0 : i32
      %24 = arith.cmpi ne, %23, %c0_i32_8 : i32
      scf.if %24 {
        %c0_12 = arith.constant 0 : index
        %c0_13 = arith.constant 0 : index
        %29 = vector.load %arg3[%c0_12, %c0_13] : memref<8x128xf32, #tpu.memory_space<vmem>>, vector<8x128xf32>
        %30 = vector.shape_cast %20 : vector<32x128xf32> to vector<4x8x128xf32>
        %cst_14 = arith.constant dense<0.000000e+00> : vector<8x128xf32>
        %31 = vector.multi_reduction <add>, %30, %cst_14 [0] : vector<4x8x128xf32> to vector<8x128xf32>
        %32 = arith.addf %29, %31 : vector<8x128xf32>
        %c0_15 = arith.constant 0 : index
        %c0_16 = arith.constant 0 : index
        %33 = vector.load %arg3[%c0_15, %c0_16] : memref<8x128xf32, #tpu.memory_space<vmem>>, vector<8x128xf32>
        tpu.vector_store %arg3[%c0_15, %c0_16], %32 {strides = array<i32>} : memref<8x128xf32, #tpu.memory_space<vmem>>, vector<8x128xf32>,
      } else {
      }
      %c32_i32_9 = arith.constant 32 : i32
      %25 = arith.addi %3, %c32_i32_9 : i32
      %c96_i32_10 = arith.constant 96 : i32
      %26 = arith.cmpi sgt, %25, %c96_i32_10 : i32
      %27 = arith.extui %26 : i1 to i32
      %c0_i32_11 = arith.constant 0 : i32
      %28 = arith.cmpi ne, %27, %c0_i32_11 : i32
      scf.if %28 {
        %29 = tpu.iota {dimensions = array<i32: 0>} : vector<32x1xi32>
        %30 = vector.broadcast %3 : i32 to vector<32x1xi32>
        %31 = arith.addi %30, %29 : vector<32x1xi32>
        %32 = tpu.iota {dimensions = array<i32: 1>} : vector<1x128xi32>
        %c96_i32_12 = arith.constant 96 : i32
        %33 = vector.broadcast %c96_i32_12 : i32 to vector<32x1xi32>
        %34 = arith.cmpi slt, %31, %33 : vector<32x1xi32>
        %c96_i32_13 = arith.constant 96 : i32
        %35 = vector.broadcast %c96_i32_13 : i32 to vector<32x1xi32>
        %36 = arith.cmpi eq, %31, %35 : vector<32x1xi32>
        %c0_i32_14 = arith.constant 0 : i32
        %37 = vector.broadcast %c0_i32_14 : i32 to vector<1x128xi32>
        %38 = arith.cmpi slt, %32, %37 : vector<1x128xi32>
        %39 = vector.broadcast %36 : vector<32x1xi1> to vector<32x128xi1>
        %40 = vector.broadcast %38 : vector<1x128xi1> to vector<32x128xi1>
        %41 = arith.andi %39, %40 : vector<32x128xi1>
        %42 = vector.broadcast %34 : vector<32x1xi1> to vector<32x128xi1>
        %43 = arith.ori %42, %41 : vector<32x128xi1>
        %c0_15 = arith.constant 0 : index
        %c0_16 = arith.constant 0 : index
        %44 = vector.load %arg3[%c0_15, %c0_16] : memref<8x128xf32, #tpu.memory_space<vmem>>, vector<8x128xf32>
        %cst_17 = arith.constant 0.000000e+00 : f32
        %45 = vector.broadcast %cst_17 : f32 to vector<32x128xf32>
        %46 = arith.select %43, %20, %45 : vector<32x128xi1>, vector<32x128xf32>
        %47 = vector.shape_cast %46 : vector<32x128xf32> to vector<4x8x128xf32>
        %cst_18 = arith.constant dense<0.000000e+00> : vector<8x128xf32>
        %48 = vector.multi_reduction <add>, %47, %cst_18 [0] : vector<4x8x128xf32> to vector<8x128xf32>
        %49 = arith.addf %44, %48 : vector<8x128xf32>
        %c0_19 = arith.constant 0 : index
        %c0_20 = arith.constant 0 : index
        %50 = vector.load %arg3[%c0_19, %c0_20] : memref<8x128xf32, #tpu.memory_space<vmem>>, vector<8x128xf32>
        tpu.vector_store %arg3[%c0_19, %c0_20], %49 {strides = array<i32>} : memref<8x128xf32, #tpu.memory_space<vmem>>, vector<8x128xf32>,
      } else {
      }
    } else {
    }
    return
  }
  func.func @transform_0(%arg0: i32) -> (i32, i32) {
    %c0_i32 = arith.constant 0 : i32
    %c0_i32_0 = arith.constant 0 : i32
    return %arg0, %c0_i32 : i32, i32
  }
  func.func @transform_1(%arg0: i32) -> (i32, i32) {
    %c0_i32 = arith.constant 0 : i32
    %c0_i32_0 = arith.constant 0 : i32
    return %arg0, %c0_i32 : i32, i32
  }
  func.func @transform_2(%arg0: i32) -> (i32, i32) {
    %c0_i32 = arith.constant 0 : i32
    %c0_i32_0 = arith.constant 0 : i32
    %c0_i32_1 = arith.constant 0 : i32
    return %c0_i32, %c0_i32_0 : i32, i32
  }
}

</mosaic_0001>

<bundles_post_ra>
// kernel: tpu_custom_call.1
= control target key start
LH: loop header
LB: loop body
LE: loop exit
PB: predicated region body
PF: predicated region fallthrough
CT: control target
= control target key end

     0   :  { %7 = vsyncpa [#allocation3], 0  ;;  %s860_s0 = inlined_call_operand.hbm [shape: bf16[96,128], index: 0, kind: input, shape index: {}]   ;;  %s861_s1 = inlined_call_operand.hbm [shape: s8[96,128], index: 1, kind: input, shape index: {}]   ;;  %s862_s2 = inlined_call_operand.hbm [shape: f32[8,128], index: 2, kind: output, shape index: {}]  }
   0x1   :  { %9 = vsyncpa [#allocation3 + $0x1], 0 }
   0x2   :  { %10 = vsyncpa [#allocation6], 0 }
   0x3   :  { %12 = vsyncpa [#allocation6 + $0x1], 0 }
   0x4   :  { %13 = vsyncpa [#allocation4], 0  ;;  %s692_s9 = smov 0   ;;  %s694_s10 = smov 0  }
   0x5   :  { %s696_s11 = smov 0   ;;  %s698_s12 = smov 0  }
   0x6 LB: > { %s711_s13 = sadd.s32 4294967295, %s671_s12   ;;  %s714_s14 = sadd.s32 1, %s671_s12   ;;  %s671_s12 = sphi %s698_s12, %s874_s12   ;;  %s667_s11 = sphi %s696_s11, %s873_s11   ;;  %s663_s10 = sphi %s694_s10, %s872_s10   ;;  %s659_s9 = sphi %s692_s9, %s871_s9  }
   0x7   : > { %s23_s15 = ssub.s32 %s671_s12, %s714_s14  ;;  %s26_s16 = sadd.s32 1, %s667_s11 }
   0x8   : > { %p24_p0 = scmp.eq.s32.totalorder %s23_s15, 0  ;;  %p33_p1 = scmp.ne.s32.totalorder %s667_s11, %s663_s10 }
   0x9   : > { %p34_p2 = scmp.eq.s32.totalorder %s671_s12, 0  ;;  %p39_p3 = scmp.ne.s32.totalorder %s663_s10, %s659_s9 }
   0xa   : > { %s724_s17 = scalar_select %p24_p0, %s667_s11, %s26_s16  }
   0xb   : > { %p726_p4 = por %p34_p2, %p33_p1  ;;  %p40_p5 = scmp.eq.s32.totalorder %s711_s13, 0 }
   0xc   : > { %p486_p6 = scmp.lt.s32.totalorder %s671_s12, 3  ;;  %s737_s20 = sand.u32 1, %s667_s11  }
   0xd   : > { %p732_p7 = por %p40_p5, %p39_p3  ;;  %s444_s21 = sshll.u32 %s737_s20, 4 }
   0xe   : > { %s461_s22 = sshll.u32 %s671_s12, 4  ;;  %s114_s26 = scalar_lea.vmem [#allocation2], %s444_s21 }
   0xf   : > { %s119_s25 = scalar_lea.hbm %s860_s0, %s461_s22  ;;  %s122_s27 = sshll.u32 %s114_s26, 4  ;;  %s123_s27 = int_to_ptr.vmem [resolvable:$true] %s122_s27 }
  0x10   : > { %s120_s28 = sshll.u32 %s119_s25, 4  ;;  %p746_p8 = pnand %p486_p6, %p726_p4  ;;  %s121_s28 = int_to_ptr.hbm [resolvable:$true] %s120_s28 }
  0x11   : > { %p449_p9 = scmp.ge.s32.totalorder %s671_s12, 1  ;;  %s111_s30 = scalar_lea.sflag [#allocation3], %s737_s20 }
  0x12   : > { %s541_s3 = sshra.s32 %s121_s28, 4  ;;  %p545_p11 = pneg %p746_p8  ;;  %s542_s3 = int_to_ptr.hbm [resolvable:$true] %s541_s3 }
  0x13   : > { %s543_s4 = scalar_lea.hbm %s542_s3, 16  ;;  %s548_s7 = scalar_lea.hbm %s860_s0, 48 }
  0x14   : > { %p544_p10 = scmp.ne.s32.totalorder %s542_s3, %s543_s4  ;;  %p549_p0 = scmp.lt.s32.totalorder %s542_s3, %s860_s0 }
  0x15   : > { %p550_p1 = scmp.lt.s32.totalorder %s548_s7, %s543_s4 }
  0x16   : > { %p546_p12 = pnand %p545_p11, %p544_p10 }
  0x17   : > { %p551_p2 = por %p550_p1, %p549_p0 }
  0x18   : > { %p547_p13 = pneg %p546_p12 }
  0x1a   : > { %p552_p3 = pnand %p551_p2, %p547_p13 }
  0x1c   : > { %555 = shalt.err (!%p552_p3)
}
  0x1d   : > { %s673_s15 = smov 64   ;;  %s674_s16 = smov 4  }
  0x1e   : > { %482 = dma.hbm_to_vmem [thread:$0]  (!%p746_p8), %s121_s28, 256, %s123_s27, %s111_s30, %s673_s15, %s673_s15, %s674_s16  }
  0x1f   : > { %p149_p4 = scmp.lt.s32.totalorder %s671_s12, 4  ;;  %s447_s18 = sshll.u32 %s737_s20, 3 }
  0x20   : > { %s448_s21 = sshll.u32 %s671_s12, 3  ;;  %s136_s26 = scalar_lea.vmem [#allocation5], %s447_s18 }
  0x21   : > { %p770_p5 = pnand %p449_p9, %p149_p4  ;;  %s140_s25 = scalar_lea.hbm %s861_s1, %s448_s21 }
  0x22   : > { %s144_s3 = sshll.u32 %s136_s26, 4  ;;  %s142_s4 = sshll.u32 %s140_s25, 4  ;;  %s145_s3 = int_to_ptr.vmem [resolvable:$true] %s144_s3  ;;  %s143_s4 = int_to_ptr.hbm [resolvable:$true] %s142_s4 }
  0x23   : > { %s133_s5 = scalar_lea.sflag [#allocation6], %s737_s20  ;;  %s571_s27 = sshra.s32 %s143_s4, 4  ;;  %s572_s27 = int_to_ptr.hbm [resolvable:$true] %s571_s27 }
  0x24   : > { %s573_s28 = scalar_lea.hbm %s572_s27, 8  ;;  %s578_s6 = scalar_lea.hbm %s861_s1, 24 }
  0x25   : > { %p574_p6 = scmp.ne.s32.totalorder %s572_s27, %s573_s28  ;;  %p579_p12 = scmp.lt.s32.totalorder %s572_s27, %s861_s1 }
  0x26   : > { %p580_p13 = scmp.lt.s32.totalorder %s578_s6, %s573_s28 }
  0x27   : > { %p576_p9 = pnand %p574_p6, %p545_p11 }
  0x28   : > { %p581_p0 = por %p580_p13, %p579_p12 }
  0x29   : > { %p577_p10 = pneg %p576_p9 }
  0x2b   : > { %p582_p1 = pnand %p581_p0, %p577_p10 }
  0x2d   : > { %585 = shalt.err (!%p582_p1)
}
  0x2e   : > { %485 = dma.hbm_to_vmem [thread:$0]  (!%p746_p8), %s143_s4, 128, %s145_s3, %s133_s5  }
  0x2f   : > { %153 = sbr.rel (%p770_p5) target bundleno = 146 (0x92), region = 28  ;;  %s155_s20 = sand.u32 (!%p770_p5), 1, %s663_s10  }
  0x30   : > { %s450_s9 = sshll.u32 (!%p770_p5), %s155_s20, 4  ;;  %s156_s15 = scalar_lea.sflag (!%p770_p5), [#allocation3], %s155_s20 }
  0x31   : > { %s159_s16 = scalar_lea.vmem (!%p770_p5), [#allocation2], %s450_s9 }
  0x34   : > { %646 = dma.done.wait (%p732_p7), %s156_s15, 256  }
  0x35   : > { %648 = vsyncadd (%p732_p7), %s156_s15, 4294967040  ;;  %s451_s18 = sshll.u32 %s155_s20, 3  ;;  %s166_s21 = scalar_lea.sflag [#allocation6], %s155_s20 }
  0x36   : > { %s169_s23 = scalar_lea.vmem [#allocation5], %s451_s18 }
  0x37   : > { %650 = dma.done.wait (%p732_p7), %s166_s21, 128  }
  0x38   : > { %652 = vsyncadd (%p732_p7), %s166_s21, 4294967168  ;;  %p452_p8 = scmp.ne.s32.totalorder %s711_s13, 0 }
  0x3a   : > { %195 = sbr.rel (%p452_p8) target bundleno = 65 (0x41), region = 40 }
  0x3f   : > { %v675_v0 = vmov 0.0  }
  0x40   : > { %196 = vst [vmem:[#allocation7] sm:$0xff] %v675_v0 }
  0x41 PF: > { %s802_s29 = sshll.u32 %s711_s13, 5 }
  0x42   : > { %p454_p11 = scmp.ge.s32.totalorder %s802_s29, 96 }
  0x43   : > { %s287_s22 = sadd.s32 (!%p454_p11), 32, %s802_s29 }
  0x44   : > { %201 = sbr.rel (%p454_p11) target bundleno = 140 (0x8c), region = 44  ;;  %p455_p7 = scmp.gt.s32.totalorder (!%p454_p11), %s287_s22, 96 }
  0x49   : > { %v463_v1 = vld [vmem:[%s159_s16] sm:$0xff]   ;;  %v470_v2 = vld [vmem:[%s159_s16 + $0x8] sm:$0xff]  }
  0x4a   : > { %v806_v3 = vunpack.c.l.bf16 %v463_v1  ;;  %v808_v4 = vunpack.c.h.bf16 %v463_v1  ;;  %v810_v5 = vunpack.c.l.bf16 %v470_v2  ;;  %v812_v6 = vunpack.c.h.bf16 %v470_v2  ;;  %v210_v17 = vld [vmem:[%s169_s23] sm:$0xff] }
  0x4b   : > { %v211_v20 = vunpack.c.0.s8 %v210_v17  ;;  %v212_v21 = vunpack.c.1.s8 %v210_v17  ;;  %v213_v22 = vunpack.c.2.s8 %v210_v17  ;;  %v214_v23 = vunpack.c.3.s8 %v210_v17 }
  0x4c   : > { %v231_v7 = vand.u32 2147483647, %v806_v3  ;;  %v232_v8 = vand.u32 2147483647, %v808_v4  ;;  %v233_v9 = vand.u32 2147483647, %v810_v5 }
  0x4d   : > { %v234_v10 = vand.u32 2147483647, %v812_v6  ;;  %v215_v25 = vcvt.s32.f32 %v211_v20  ;;  %v219_v27 = vmax.f32 %v806_v3, 0.0  ;;  %v216_v31 = vcvt.s32.f32 %v212_v21 }
  0x4e   : > { %v235_v11 = vsub.f32 0.0, %v231_v7  ;;  %v236_v12 = vsub.f32 0.0, %v232_v8  ;;  %v237_v13 = vsub.f32 0.0, %v233_v9  ;;  %v220_v32 = vmax.f32 %v808_v4, 0.0 }
  0x4f   : > { %v238_v14 = vsub.f32 0.0, %v234_v10  ;;  %v217_v36 = vcvt.s32.f32 %v213_v22  ;;  %v218_v37 = vcvt.s32.f32 %v214_v23  ;;  %v223_v39 = vmul.f32 %v806_v3, %v215_v25 }
  0x50   : > { %v239_v15 = vmul.f32 1.442695, %v235_v11  ;;  %v241_v16 = vmul.f32 1.442695, %v236_v12  ;;  %v243_v18 = vmul.f32 1.442695, %v237_v13  ;;  %v224_v45 = vmul.f32 %v808_v4, %v216_v31 }
  0x51   : > { %v245_v19 = vmul.f32 1.442695, %v238_v14  ;;  %v221_v49 = vmax.f32 %v810_v5, 0.0  ;;  %v225_v50 = vmul.f32 %v810_v5, %v217_v36  ;;  %v222_v52 = vmax.f32 %v812_v6, 0.0 }
  0x52   : > { %525 = vpow2.f32 %v239_v15  ;;  %v226_v53 = vmul.f32 %v812_v6, %v218_v37  ;;  %v227_v57 = vsub.f32 %v219_v27, %v223_v39  ;;  %v228_v62 = vsub.f32 %v220_v32, %v224_v45 }
  0x53   : > { %527 = vpow2.f32 %v241_v16  ;;  %v229_v3 = vsub.f32 %v221_v49, %v225_v50 }
  0x54   : > { %529 = vpow2.f32 %v243_v18  ;;  %v230_v9 = vsub.f32 %v222_v52, %v226_v53 }
  0x55   : > { %531 = vpow2.f32 %v245_v19 }
  0x58   : > { %v526_v24 = vpop.eup %525 }
  0x59   : > { %v528_v26 = vpop.eup %527  ;;  %v247_v28 = vadd.f32 1.0, %v526_v24  ;;  %v250_v29 = vmul.f32 -0.5, %v526_v24  ;;  %v253_v42 = vand.u32 2147483647, %v526_v24 }
  0x5a   : > { %v530_v30 = vpop.eup %529  ;;  %v256_v33 = vadd.f32 1.0, %v528_v26  ;;  %v259_v34 = vmul.f32 -0.5, %v528_v26  ;;  %v262_v46 = vand.u32 2147483647, %v528_v26 }
  0x5b   : > { %v532_v35 = vpop.eup %531  ;;  %533 = vlog2.f32 %v247_v28  ;;  %v265_v38 = vadd.f32 1.0, %v530_v30  ;;  %v251_v40 = vadd.f32 1.0, %v250_v29  ;;  %v268_v41 = vmul.f32 -0.5, %v530_v30 }
  0x5c   : > { %535 = vlog2.f32 %v256_v33  ;;  %v260_v43 = vadd.f32 1.0, %v259_v34  ;;  %v274_v44 = vadd.f32 1.0, %v532_v35  ;;  %v277_v48 = vmul.f32 -0.5, %v532_v35 }
  0x5d   : > { %537 = vlog2.f32 %v265_v38  ;;  %v269_v47 = vadd.f32 1.0, %v268_v41  ;;  %v271_v51 = vand.u32 2147483647, %v530_v30  ;;  %v252_v54 = vmul.f32 %v526_v24, %v251_v40 }
  0x5e   : > { %539 = vlog2.f32 %v274_v44  ;;  %v278_v55 = vadd.f32 1.0, %v277_v48  ;;  %vm826_vm0 = vcmp.lt.f32.partialorder %v253_v42, 0.0004427343  ;;  %v261_v59 = vmul.f32 %v528_v26, %v260_v43 }
  0x5f   : > { %v280_v60 = vand.u32 2147483647, %v532_v35  ;;  %vm830_vm1 = vcmp.lt.f32.partialorder %v262_v46, 0.0004427343  ;;  %v270_v1 = vmul.f32 %v530_v30, %v269_v47  ;;  %vm272_vm2 = vcmp.lt.f32.partialorder %v271_v51, 0.0004427343 }
  0x60   : > { %v279_v7 = vmul.f32 %v532_v35, %v278_v55 }
  0x61   : > { %v534_v56 = vpop.eup %533  ;;  %vm281_vm3 = vcmp.lt.f32.partialorder %v280_v60, 0.0004427343 }
  0x62   : > { %v536_v61 = vpop.eup %535  ;;  %v249_v63 = vmul.f32 0.6931472, %v534_v56 }
  0x63   : > { %v538_v2 = vpop.eup %537  ;;  %v258_v4 = vmul.f32 0.6931472, %v536_v61 }
  0x64   : > { %v255_v5 = vsel %vm826_vm0, %v252_v54, %v249_v63  ;;  %v267_v6 = vmul.f32 0.6931472, %v538_v2  ;;  %v540_v8 = vpop.eup %539  ;;  %291 = sbr.rel (%p455_p7) target bundleno = 114 (0x72), region = 48 }
  0x65   : > { %v264_v10 = vsel %vm830_vm1, %v261_v59, %v258_v4  ;;  %v283_v11 = vadd.f32 %v255_v5, %v227_v57  ;;  %v276_v13 = vmul.f32 0.6931472, %v540_v8 }
  0x66   : > { %v273_v12 = vsel %vm272_vm2, %v270_v1, %v267_v6  ;;  %v284_v14 = vadd.f32 %v264_v10, %v228_v62 }
  0x67   : > { %v285_v15 = vadd.f32 %v273_v12, %v229_v3  ;;  %v282_v16 = vsel %vm281_vm3, %v279_v7, %v276_v13 }
  0x68   : > { %v286_v17 = vadd.f32 %v282_v16, %v230_v9 }
  0x69   : > { %v293_v18 = vadd.f32 %v284_v14, %v283_v11  ;;  %v292_v20 = vld [vmem:[#allocation7] sm:$0xff] }
  0x6b   : > { %v294_v19 = vadd.f32 %v293_v18, %v285_v15 }
  0x6d   : > { %v295_v21 = vadd.f32 %v294_v19, %v286_v17 }
  0x6f   : > { %v296_v22 = vadd.f32 %v295_v21, %v292_v20 }
  0x71   : > { %297 = vst [vmem:[#allocation7] sm:$0xff] %v296_v22 }
  0x72 PF: > { %p456_p2 = scmp.le.s32.totalorder %s287_s22, 96 }
  0x74   : > { %301 = sbr.rel (%p456_p2) target bundleno = 140 (0x8c), region = 52 }
  0x79   : > { %v302_v23 = vlaneseq  ;;  %v307_v24 = vstv %s802_s29  ;;  %v349_v39 = vld [vmem:[#allocation7] sm:$0xff] }
  0x7b   : > { %v303_v25 = vshrl.u32 %v302_v23, 7 }
  0x7d   : > { %v304_v26 = vadd.s32 8, %v303_v25  ;;  %v305_v27 = vadd.s32 16, %v303_v25  ;;  %v306_v28 = vadd.s32 24, %v303_v25  ;;  %v308_v29 = vadd.s32 %v307_v24, %v303_v25 }
  0x7f   : > { %v309_v30 = vadd.s32 %v307_v24, %v304_v26  ;;  %v310_v31 = vadd.s32 %v307_v24, %v305_v27  ;;  %v311_v32 = vadd.s32 %v307_v24, %v306_v28  ;;  %vm314_vm4 = vcmp.lt.s32.totalorder %v308_v29, 96 }
  0x80   : > { %v350_v33 = vsel %vm314_vm4, %v283_v11, 0.0 }
  0x81   : > { %vm315_vm5 = vcmp.lt.s32.totalorder %v309_v30, 96  ;;  %vm316_vm6 = vcmp.lt.s32.totalorder %v310_v31, 96  ;;  %vm317_vm7 = vcmp.lt.s32.totalorder %v311_v32, 96 }
  0x82   : > { %v351_v34 = vsel %vm315_vm5, %v284_v14, 0.0  ;;  %v352_v35 = vsel %vm316_vm6, %v285_v15, 0.0  ;;  %v353_v37 = vsel %vm317_vm7, %v286_v17, 0.0 }
  0x83   : > { %v354_v36 = vadd.f32 %v351_v34, %v350_v33 }
  0x85   : > { %v355_v38 = vadd.f32 %v354_v36, %v352_v35 }
  0x87   : > { %v356_v40 = vadd.f32 %v355_v38, %v353_v37 }
  0x89   : > { %v357_v41 = vadd.f32 %v356_v40, %v349_v39 }
  0x8b   : > { %358 = vst [vmem:[#allocation7] sm:$0xff] %v357_v41 }
  0x8c PF: > { %p487_p3 = scmp.eq.s32.totalorder %s711_s13, 2  ;;  %s367_s25 = sshll.u32 %s862_s2, 4  ;;  %s368_s25 = int_to_ptr.hbm [resolvable:$true] %s367_s25 }
  0x8d   : > { %s676_s26 = smov [#allocation7]  }
  0x8e   : > { %s365_s3 = sshll.u32 %s676_s26, 4  ;;  %s366_s3 = int_to_ptr.vmem [resolvable:$true] %s365_s3 }
  0x8f   : > { %476 = dma.vmem_to_hbm [thread:$0]  (%p487_p3), %s366_s3, 128, %s368_s25, [#allocation4]  }
  0x90   : > { %654 = dma.done.wait (%p487_p3), [#allocation4], 128  }
  0x91   : > { %656 = vsyncadd (%p487_p3), [#allocation4], 4294967168 }
  0x92 PF: > { %p16_p4 = scmp.ge.s32.totalorder %s714_s14, 5   ;;  %s871_s9 = smov %s663_s10 }
  0x93   : > { %s872_s10 = smov %s667_s11  ;;  %s873_s11 = smov %s724_s17 }
  0x94   : > { %s874_s12 = smov %s714_s14  ;;  %18 = sbr.rel (!%p16_p4) target bundleno = 6 (0x6), region = 94 }
  0x99   :  { %381 = vsyncpa [#allocation3], 1 }
  0x9a   :  { %383 = vsyncpa [#allocation3 + $0x1], 1 }
  0x9b   :  { %384 = vsyncpa [#allocation6], 1 }
  0x9c   :  { %386 = vsyncpa [#allocation6 + $0x1], 1 }
  0x9d   :  { %387 = vsyncpa [#allocation4], 1 }
  0x9e   :  { %389 = vsyncpa [#allocation4 + $0x1], 1 }

</bundles_post_ra>
